<compile_context>
chip_gen: v7x
topology: tpu7x:2x2x1
jax: 0.10.0
libtpu: 0.0.40
codegen_flags: <defaults>
</compile_context>

<pallas_src>
import functools

import jax
import jax.numpy as jnp
from jax.experimental import pallas as pl
from jax.experimental.pallas import tpu as pltpu


# ----------------------------------------------------------------------------
# helpers
# ----------------------------------------------------------------------------
def _round_up(x, m):
    return ((x + m - 1) // m) * m


def _vmem_caps():
    """Returns (vmem_limit_bytes for the compiler, per-step working-set budget)."""
    try:
        info = pltpu.get_tpu_info()
        cap = int(getattr(info, "vmem_capacity_bytes", 0)) or (64 << 20)
    except Exception:  # defensive: fall back to the smallest generation (v7x)
        cap = 64 << 20
    vmem_limit = min(cap // 2, 96 << 20)   # ~50% headroom for double buffering
    return vmem_limit, vmem_limit // 2


def _pick_pixel_tile(p_pad, k_dim, in_itemsize, cout, out_itemsize, budget, n_batch):
    """Largest multiple-of-128 divisor of p_pad that fits the VMEM budget
    (double-buffered (K, TP) input + (Cout, TP) output); keeps >=2 pixel tiles
    when N == 1 so both v7x TensorCores get work."""
    per_col = 2 * k_dim * in_itemsize + 2 * cout * max(out_itemsize, 4)
    cap = max(128, (budget // max(per_col, 1)) // 128 * 128)
    best = 128
    d = 128
    while d <= p_pad:
        if p_pad % d == 0 and d <= cap:
            if n_batch > 1 or d <= max(p_pad // 2, 128) or p_pad == 128:
                best = d
        d += 128
    return best


# ----------------------------------------------------------------------------
# kernels
# ----------------------------------------------------------------------------
def _conv_fused_kernel(x_ref, w_ref, b_ref, o_ref, *, cin, wp, taps, p_out):
    """In-kernel im2col (stride == 1).

    x_ref: (Cin, Lp)     flattened, zero-padded image (lanes = flat pixels)
    w_ref: (Cout, K)     weights, K ordered (tap_h, tap_w, cin)
    b_ref: (Cout, 1)     f32 bias
    o_ref: (Cout, P_out) lane-dense output (P_out multiple of 128, width-wrapped)
    """
    acc = None
    for t, (i, j) in enumerate(taps):
        off = i * wp + j                               # static tap offset
        win = x_ref[:, off:off + p_out]                # (Cin, P_out), static slice
        wt = w_ref[:, t * cin:(t + 1) * cin]           # (Cout, Cin)
        part = jnp.dot(wt, win, preferred_element_type=jnp.float32)
        acc = part if acc is None else acc + part
    o_ref[...] = (acc + b_ref[...]).astype(o_ref.dtype)


def _conv_im2col_kernel(x_ref, w_ref, b_ref, o_ref):
    """Fallback: one fused matmul on pre-built im2col patches.

    x_ref: (K, TP)   patch tile   w_ref: (Cout, K)   b_ref: (Cout, 1)
    o_ref: (Cout, TP)
    """
    acc = jnp.dot(w_ref[...], x_ref[...], preferred_element_type=jnp.float32)
    o_ref[...] = (acc + b_ref[...]).astype(o_ref.dtype)


# ----------------------------------------------------------------------------
# wrapper
# ----------------------------------------------------------------------------
def conv_layer_forward(x_nchw, weight_oihw, bias, *, stride, padding,
                       compute_dtype=None):
    """Equivalent of ConvLayer.forward: out = Conv2d(x), NCHW in / NCHW out."""
    n, cin, h, w = x_nchw.shape
    cout, cin_w, kh, kw = weight_oihw.shape
    assert cin == cin_w, "grouped conv not supported"

    ho = (h + 2 * padding - kh) // stride + 1
    wo = (w + 2 * padding - kw) // stride + 1
    assert ho > 0 and wo > 0

    out_dtype = x_nchw.dtype
    cdt = compute_dtype if compute_dtype is not None else x_nchw.dtype
    in_itemsize = jnp.dtype(cdt).itemsize
    out_itemsize = jnp.dtype(out_dtype).itemsize

    # Weights as (Cout, K) with K ordered (tap_h, tap_w, cin); bias (Cout,1) f32.
    k_dim = kh * kw * cin
    w2 = jnp.transpose(weight_oihw, (0, 2, 3, 1)).reshape(cout, k_dim).astype(cdt)
    b2 = bias.reshape(cout, 1).astype(jnp.float32)

    vmem_limit, budget = _vmem_caps()

    # ------------------------------------------------------------------ path 1
    if stride == 1:
        hp, wp = h + 2 * padding, w + 2 * padding
        p_out = _round_up(ho * wp, 128)                          # lane-dense store
        lp = _round_up(p_out + (kh - 1) * wp + (kw - 1), 128)    # tap over-read tail
        est = (2 * cin * lp * in_itemsize            # double-buffered input block
               + 2 * cout * p_out * out_itemsize     # double-buffered output block
               + cout * p_out * 4                    # f32 accumulator
               + kh * kw * cin * p_out * in_itemsize)  # tap-slice temporaries
        if est <= budget:
            xq = x_nchw.astype(cdt)                  # bf16 cast BEFORE pad/flatten
            x_pad = jnp.pad(xq, ((0, 0), (0, 0),
                                 (padding, padding), (padding, padding)))
            x_flat = x_pad.reshape(n, cin, hp * wp)              # free reshape
            x_flat = jnp.pad(x_flat, ((0, 0), (0, 0), (0, lp - hp * wp)))

            taps = tuple((i, j) for i in range(kh) for j in range(kw))
            kernel = functools.partial(_conv_fused_kernel, cin=cin, wp=wp,
                                       taps=taps, p_out=p_out)
            out = pl.pallas_call(
                kernel,
                out_shape=jax.ShapeDtypeStruct((n, cout, p_out), out_dtype),
                grid=(n,),
                in_specs=[
                    pl.BlockSpec((None, cin, lp), lambda b: (b, 0, 0)),
                    pl.BlockSpec((cout, k_dim), lambda b: (0, 0)),
                    pl.BlockSpec((cout, 1), lambda b: (0, 0)),
                ],
                out_specs=pl.BlockSpec((None, cout, p_out), lambda b: (b, 0, 0)),
                compiler_params=pltpu.CompilerParams(
                    dimension_semantics=("parallel",),
                    vmem_limit_bytes=vmem_limit),
            )(x_flat, w2, b2)
            # Drop the wrapped / padded columns; cheap slice of the small output.
            return out[:, :, :ho * wp].reshape(n, cout, ho, wp)[:, :, :, :wo]

    # ------------------------------------------------------------------ path 2
    # Wrapper im2col fallback: built directly from padded NCHW (no transposes),
    # bf16 cast before the KH*KW expansion, pixel axis padded to 128.
    xq = x_nchw.astype(cdt)
    x_pad = jnp.pad(xq, ((0, 0), (0, 0), (padding, padding), (padding, padding)))
    taps = []
    for i in range(kh):
        for j in range(kw):
            taps.append(x_pad[:, :, i:i + (ho - 1) * stride + 1:stride,
                                    j:j + (wo - 1) * stride + 1:stride])
    patches = jnp.stack(taps, axis=1)                    # (N, T, Cin, Ho, Wo)
    p = ho * wo
    p_pad = _round_up(p, 128)
    patches = patches.reshape(n, k_dim, p)
    if p_pad != p:
        patches = jnp.pad(patches, ((0, 0), (0, 0), (0, p_pad - p)))

    tp = _pick_pixel_tile(p_pad, k_dim, in_itemsize, cout, out_itemsize, budget, n)
    grid = (n, p_pad // tp)

    out = pl.pallas_call(
        _conv_im2col_kernel,
        out_shape=jax.ShapeDtypeStruct((n, cout, p_pad), out_dtype),
        grid=grid,
        in_specs=[
            pl.BlockSpec((None, k_dim, tp), lambda b, pi: (b, 0, pi)),
            pl.BlockSpec((cout, k_dim), lambda b, pi: (0, 0)),
            pl.BlockSpec((cout, 1), lambda b, pi: (0, 0)),
        ],
        out_specs=pl.BlockSpec((None, cout, tp), lambda b, pi: (b, 0, pi)),
        compiler_params=pltpu.CompilerParams(
            dimension_semantics=("parallel", "parallel"),
            vmem_limit_bytes=vmem_limit),
    )(patches, w2, b2)

    return out[:, :, :p].reshape(n, cout, ho, wo)


# ----------------------------------------------------------------------------
# self-test
# ----------------------------------------------------------------------------
if __name__ == "__main__":
    # ConvLayer(in_channels=4, out_channels=8, kernel_size=3, stride=1, padding=1)
    in_channels, out_channels = 4, 8
    kernel_size, stride, padding = 3, 1, 1
    batch, height, width = 2, 16, 16

    key = jax.random.PRNGKey(0)
    kx, kw_, kb = jax.random.split(key, 3)

    x = jax.random.normal(kx, (batch, in_channels, height, width), jnp.float32)
    fan_in = in_channels * kernel_size * kernel_size
    bound = 1.0 / (fan_in ** 0.5)
    weight = jax.random.uniform(
        kw_, (out_channels, in_channels, kernel_size, kernel_size),
        jnp.float32, minval=-bound, maxval=bound)
    bias = jax.random.uniform(kb, (out_channels,), jnp.float32,
                              minval=-bound, maxval=bound)

    def xla_ref(xv, wv, bv, s, p):
        return jax.lax.conv_general_dilated(
            xv, wv, window_strides=(s, s), padding=[(p, p), (p, p)],
            dimension_numbers=("NCHW", "OIHW", "NCHW"),
        ) + bv.reshape(1, -1, 1, 1)

    # f32, stride 1: fused in-kernel-im2col path.  (2e-2 tolerance covers the
    # default bf16-pass MXU precision of f32 matmuls on TPU.)
    ref = xla_ref(x, weight, bias, stride, padding)
    out = jax.block_until_ready(
        conv_layer_forward(x, weight, bias, stride=stride, padding=padding))
    assert out.shape == ref.shape
    assert jnp.allclose(out, ref, atol=2e-2, rtol=2e-2)

    # bf16 compute (f32 accumulation) on the same path.
    out_bf16 = jax.block_until_ready(
        conv_layer_forward(x, weight, bias, stride=stride, padding=padding,
                           compute_dtype=jnp.bfloat16))
    assert jnp.allclose(out_bf16, ref, atol=1e-1, rtol=1e-1)

    # stride 2 exercises the (improved) wrapper-im2col fallback path.
    ref2 = xla_ref(x, weight, bias, 2, padding)
    out2 = jax.block_until_ready(
        conv_layer_forward(x, weight, bias, stride=2, padding=padding))
    assert out2.shape == ref2.shape
    assert jnp.allclose(out2, ref2, atol=2e-2, rtol=2e-2)

    print("KERNEL_OK")
</pallas_src>

<mosaic_0001>
module attributes {stable_mosaic.version = 11 : i64} {
  func.func @_conv_fused_kernel(%arg0: i32, %arg1: memref<1x4x512xf32, #tpu.memory_space<vmem>>, %arg2: memref<8x36xf32, #tpu.memory_space<vmem>>, %arg3: memref<8x1xf32, #tpu.memory_space<vmem>>, %arg4: memref<1x8x384xf32, #tpu.memory_space<vmem>>) attributes {dimension_semantics = [#tpu.dimension_semantics<parallel>], iteration_bounds = array<i64: 2>, scalar_prefetch = 0 : i64, scratch_operands = 0 : i64, tpu.core_type = #tpu.core_type<tc>, window_params = [{transform_indices = @transform_0, window_bounds = array<i64: 1, 4, 512>}, {pipeline_mode = #tpu.pipeline_mode<synchronous>, transform_indices = @transform_1, window_bounds = array<i64: 8, 36>}, {pipeline_mode = #tpu.pipeline_mode<synchronous>, transform_indices = @transform_2, window_bounds = array<i64: 8, 1>}, {transform_indices = @transform_3, window_bounds = array<i64: 1, 8, 384>}]} {
    %c0 = arith.constant 0 : index
    %c0_0 = arith.constant 0 : index
    %c0_1 = arith.constant 0 : index
    %0 = vector.load %arg1[%c0, %c0_0, %c0_1] : memref<1x4x512xf32, #tpu.memory_space<vmem>>, vector<1x4x384xf32>
    %1 = vector.shape_cast %0 : vector<1x4x384xf32> to vector<4x384xf32>
    %c0_2 = arith.constant 0 : index
    %c0_3 = arith.constant 0 : index
    %2 = vector.load %arg2[%c0_2, %c0_3] : memref<8x36xf32, #tpu.memory_space<vmem>>, vector<8x4xf32>
    %cst = arith.constant dense<0.000000e+00> : vector<8x384xf32>
    %3 = tpu.matmul %2, %1, %cst {dimension_numbers = #tpu.dot_dimension_numbers<[1], [0], [0], [1], [0, 0, 1, 1], [], []>} : vector<8x4xf32>, vector<4x384xf32>, vector<8x384xf32> -> vector<8x384xf32>
    %c0_4 = arith.constant 0 : index
    %c0_5 = arith.constant 0 : index
    %c1 = arith.constant 1 : index
    %4 = vector.load %arg1[%c0_4, %c0_5, %c1] : memref<1x4x512xf32, #tpu.memory_space<vmem>>, vector<1x4x384xf32>
    %5 = vector.shape_cast %4 : vector<1x4x384xf32> to vector<4x384xf32>
    %c0_6 = arith.constant 0 : index
    %c4 = arith.constant 4 : index
    %6 = vector.load %arg2[%c0_6, %c4] : memref<8x36xf32, #tpu.memory_space<vmem>>, vector<8x4xf32>
    %cst_7 = arith.constant dense<0.000000e+00> : vector<8x384xf32>
    %7 = tpu.matmul %6, %5, %cst_7 {dimension_numbers = #tpu.dot_dimension_numbers<[1], [0], [0], [1], [0, 0, 1, 1], [], []>} : vector<8x4xf32>, vector<4x384xf32>, vector<8x384xf32> -> vector<8x384xf32>
    %8 = arith.addf %3, %7 : vector<8x384xf32>
    %c0_8 = arith.constant 0 : index
    %c0_9 = arith.constant 0 : index
    %c2 = arith.constant 2 : index
    %9 = vector.load %arg1[%c0_8, %c0_9, %c2] : memref<1x4x512xf32, #tpu.memory_space<vmem>>, vector<1x4x384xf32>
    %10 = vector.shape_cast %9 : vector<1x4x384xf32> to vector<4x384xf32>
    %c0_10 = arith.constant 0 : index
    %c8 = arith.constant 8 : index
    %11 = vector.load %arg2[%c0_10, %c8] : memref<8x36xf32, #tpu.memory_space<vmem>>, vector<8x4xf32>
    %cst_11 = arith.constant dense<0.000000e+00> : vector<8x384xf32>
    %12 = tpu.matmul %11, %10, %cst_11 {dimension_numbers = #tpu.dot_dimension_numbers<[1], [0], [0], [1], [0, 0, 1, 1], [], []>} : vector<8x4xf32>, vector<4x384xf32>, vector<8x384xf32> -> vector<8x384xf32>
    %13 = arith.addf %8, %12 : vector<8x384xf32>
    %c0_12 = arith.constant 0 : index
    %c0_13 = arith.constant 0 : index
    %c18 = arith.constant 18 : index
    %14 = vector.load %arg1[%c0_12, %c0_13, %c18] : memref<1x4x512xf32, #tpu.memory_space<vmem>>, vector<1x4x384xf32>
    %15 = vector.shape_cast %14 : vector<1x4x384xf32> to vector<4x384xf32>
    %c0_14 = arith.constant 0 : index
    %c12 = arith.constant 12 : index
    %16 = vector.load %arg2[%c0_14, %c12] : memref<8x36xf32, #tpu.memory_space<vmem>>, vector<8x4xf32>
    %cst_15 = arith.constant dense<0.000000e+00> : vector<8x384xf32>
    %17 = tpu.matmul %16, %15, %cst_15 {dimension_numbers = #tpu.dot_dimension_numbers<[1], [0], [0], [1], [0, 0, 1, 1], [], []>} : vector<8x4xf32>, vector<4x384xf32>, vector<8x384xf32> -> vector<8x384xf32>
    %18 = arith.addf %13, %17 : vector<8x384xf32>
    %c0_16 = arith.constant 0 : index
    %c0_17 = arith.constant 0 : index
    %c19 = arith.constant 19 : index
    %19 = vector.load %arg1[%c0_16, %c0_17, %c19] : memref<1x4x512xf32, #tpu.memory_space<vmem>>, vector<1x4x384xf32>
    %20 = vector.shape_cast %19 : vector<1x4x384xf32> to vector<4x384xf32>
    %c0_18 = arith.constant 0 : index
    %c16 = arith.constant 16 : index
    %21 = vector.load %arg2[%c0_18, %c16] : memref<8x36xf32, #tpu.memory_space<vmem>>, vector<8x4xf32>
    %cst_19 = arith.constant dense<0.000000e+00> : vector<8x384xf32>
    %22 = tpu.matmul %21, %20, %cst_19 {dimension_numbers = #tpu.dot_dimension_numbers<[1], [0], [0], [1], [0, 0, 1, 1], [], []>} : vector<8x4xf32>, vector<4x384xf32>, vector<8x384xf32> -> vector<8x384xf32>
    %23 = arith.addf %18, %22 : vector<8x384xf32>
    %c0_20 = arith.constant 0 : index
    %c0_21 = arith.constant 0 : index
    %c20 = arith.constant 20 : index
    %24 = vector.load %arg1[%c0_20, %c0_21, %c20] : memref<1x4x512xf32, #tpu.memory_space<vmem>>, vector<1x4x384xf32>
    %25 = vector.shape_cast %24 : vector<1x4x384xf32> to vector<4x384xf32>
    %c0_22 = arith.constant 0 : index
    %c20_23 = arith.constant 20 : index
    %26 = vector.load %arg2[%c0_22, %c20_23] : memref<8x36xf32, #tpu.memory_space<vmem>>, vector<8x4xf32>
    %cst_24 = arith.constant dense<0.000000e+00> : vector<8x384xf32>
    %27 = tpu.matmul %26, %25, %cst_24 {dimension_numbers = #tpu.dot_dimension_numbers<[1], [0], [0], [1], [0, 0, 1, 1], [], []>} : vector<8x4xf32>, vector<4x384xf32>, vector<8x384xf32> -> vector<8x384xf32>
    %28 = arith.addf %23, %27 : vector<8x384xf32>
    %c0_25 = arith.constant 0 : index
    %c0_26 = arith.constant 0 : index
    %c36 = arith.constant 36 : index
    %29 = vector.load %arg1[%c0_25, %c0_26, %c36] : memref<1x4x512xf32, #tpu.memory_space<vmem>>, vector<1x4x384xf32>
    %30 = vector.shape_cast %29 : vector<1x4x384xf32> to vector<4x384xf32>
    %c0_27 = arith.constant 0 : index
    %c24 = arith.constant 24 : index
    %31 = vector.load %arg2[%c0_27, %c24] : memref<8x36xf32, #tpu.memory_space<vmem>>, vector<8x4xf32>
    %cst_28 = arith.constant dense<0.000000e+00> : vector<8x384xf32>
    %32 = tpu.matmul %31, %30, %cst_28 {dimension_numbers = #tpu.dot_dimension_numbers<[1], [0], [0], [1], [0, 0, 1, 1], [], []>} : vector<8x4xf32>, vector<4x384xf32>, vector<8x384xf32> -> vector<8x384xf32>
    %33 = arith.addf %28, %32 : vector<8x384xf32>
    %c0_29 = arith.constant 0 : index
    %c0_30 = arith.constant 0 : index
    %c37 = arith.constant 37 : index
    %34 = vector.load %arg1[%c0_29, %c0_30, %c37] : memref<1x4x512xf32, #tpu.memory_space<vmem>>, vector<1x4x384xf32>
    %35 = vector.shape_cast %34 : vector<1x4x384xf32> to vector<4x384xf32>
    %c0_31 = arith.constant 0 : index
    %c28 = arith.constant 28 : index
    %36 = vector.load %arg2[%c0_31, %c28] : memref<8x36xf32, #tpu.memory_space<vmem>>, vector<8x4xf32>
    %cst_32 = arith.constant dense<0.000000e+00> : vector<8x384xf32>
    %37 = tpu.matmul %36, %35, %cst_32 {dimension_numbers = #tpu.dot_dimension_numbers<[1], [0], [0], [1], [0, 0, 1, 1], [], []>} : vector<8x4xf32>, vector<4x384xf32>, vector<8x384xf32> -> vector<8x384xf32>
    %38 = arith.addf %33, %37 : vector<8x384xf32>
    %c0_33 = arith.constant 0 : index
    %c0_34 = arith.constant 0 : index
    %c38 = arith.constant 38 : index
    %39 = vector.load %arg1[%c0_33, %c0_34, %c38] : memref<1x4x512xf32, #tpu.memory_space<vmem>>, vector<1x4x384xf32>
    %40 = vector.shape_cast %39 : vector<1x4x384xf32> to vector<4x384xf32>
    %c0_35 = arith.constant 0 : index
    %c32 = arith.constant 32 : index
    %41 = vector.load %arg2[%c0_35, %c32] : memref<8x36xf32, #tpu.memory_space<vmem>>, vector<8x4xf32>
    %cst_36 = arith.constant dense<0.000000e+00> : vector<8x384xf32>
    %42 = tpu.matmul %41, %40, %cst_36 {dimension_numbers = #tpu.dot_dimension_numbers<[1], [0], [0], [1], [0, 0, 1, 1], [], []>} : vector<8x4xf32>, vector<4x384xf32>, vector<8x384xf32> -> vector<8x384xf32>
    %43 = arith.addf %38, %42 : vector<8x384xf32>
    %c0_37 = arith.constant 0 : index
    %c0_38 = arith.constant 0 : index
    %44 = vector.load %arg3[%c0_37, %c0_38] : memref<8x1xf32, #tpu.memory_space<vmem>>, vector<8x1xf32>
    %45 = vector.broadcast %44 : vector<8x1xf32> to vector<8x384xf32>
    %46 = arith.addf %43, %45 : vector<8x384xf32>
    %c0_39 = arith.constant 0 : index
    %c0_40 = arith.constant 0 : index
    %c0_41 = arith.constant 0 : index
    %47 = vector.load %arg4[%c0_39, %c0_40, %c0_41] : memref<1x8x384xf32, #tpu.memory_space<vmem>>, vector<1x8x384xf32>
    %48 = vector.shape_cast %47 : vector<1x8x384xf32> to vector<8x384xf32>
    %49 = vector.shape_cast %46 : vector<8x384xf32> to vector<1x8x384xf32>
    tpu.vector_store %arg4[%c0_39, %c0_40, %c0_41], %49 {strides = array<i32>} : memref<1x8x384xf32, #tpu.memory_space<vmem>>, vector<1x8x384xf32>,
    return
  }
  func.func @transform_0(%arg0: i32) -> (i32, i32, i32) {
    %c0_i32 = arith.constant 0 : i32
    %c0_i32_0 = arith.constant 0 : i32
    %c0_i32_1 = arith.constant 0 : i32
    return %arg0, %c0_i32, %c0_i32_0 : i32, i32, i32
  }
  func.func @transform_1(%arg0: i32) -> (i32, i32) {
    %c0_i32 = arith.constant 0 : i32
    %c0_i32_0 = arith.constant 0 : i32
    %c0_i32_1 = arith.constant 0 : i32
    return %c0_i32, %c0_i32_0 : i32, i32
  }
  func.func @transform_2(%arg0: i32) -> (i32, i32) {
    %c0_i32 = arith.constant 0 : i32
    %c0_i32_0 = arith.constant 0 : i32
    %c0_i32_1 = arith.constant 0 : i32
    return %c0_i32, %c0_i32_0 : i32, i32
  }
  func.func @transform_3(%arg0: i32) -> (i32, i32, i32) {
    %c0_i32 = arith.constant 0 : i32
    %c0_i32_0 = arith.constant 0 : i32
    %c0_i32_1 = arith.constant 0 : i32
    return %arg0, %c0_i32, %c0_i32_0 : i32, i32, i32
  }
}

</mosaic_0001>

<bundles_post_ra>
// kernel: tpu_custom_call.1
= control target key start
LH: loop header
LB: loop body
LE: loop exit
PB: predicated region body
PF: predicated region fallthrough
CT: control target
= control target key end

     0   :  { %8 = vsyncpa [#allocation3], 0  ;;  %s2483_s0 = inlined_call_operand.hbm [shape: f32[2,4,512], index: 0, kind: input, shape index: {}]   ;;  %s2484_s1 = inlined_call_operand.vmem [shape: f32[8,36], index: 1, kind: input, shape index: {}]   ;;  %s2485_s2 = inlined_call_operand.vmem [shape: f32[8,1], index: 2, kind: input, shape index: {}]   ;;  %s2486_s3 = inlined_call_operand.hbm [shape: f32[2,8,384], index: 3, kind: output, shape index: {}]  }
   0x1   :  { %10 = vsyncpa [#allocation3 + $0x1], 0 }
   0x2   :  { %11 = vsyncpa [#allocation4], 0 }
   0x3   :  { %13 = vsyncpa [#allocation4 + $0x1], 0  ;;  %s2172_s12 = smov 0   ;;  %s2174_s13 = smov 0  }
   0x4   :  { %s2176_s14 = smov 0   ;;  %s2178_s15 = smov 0  }
   0x5 LB: > { %s2193_s16 = sadd.s32 4294967295, %s2130_s15   ;;  %s1829_s17 = sadd.s32 4294967294, %s2130_s15   ;;  %s2130_s15 = sphi %s2178_s15, %s2501_s15   ;;  %s2126_s14 = sphi %s2176_s14, %s2500_s14   ;;  %s2122_s13 = sphi %s2174_s13, %s2499_s13   ;;  %s2118_s12 = sphi %s2172_s12, %s2498_s12  }
   0x6   : > { %s2197_s18 = sadd.s32 1, %s2130_s15   ;;  %s26_s19 = sadd.s32 1, %s2126_s14 }
   0x7   : > { %s23_s20 = ssub.s32 %s2130_s15, %s2197_s18  ;;  %p33_p0 = scmp.ne.s32.totalorder %s2126_s14, %s2122_s13 }
   0x8   : > { %p24_p1 = scmp.eq.s32.totalorder %s23_s20, 0  ;;  %p34_p2 = scmp.eq.s32.totalorder %s2130_s15, 0 }
   0x9   : > { %p39_p3 = scmp.ne.s32.totalorder %s2122_s13, %s2118_s12  ;;  %p40_p4 = scmp.eq.s32.totalorder %s2193_s16, 0 }
   0xa   : > { %s2209_s21 = scalar_select %p24_p1, %s2126_s14, %s26_s19  }
   0xb   : > { %p2211_p5 = por %p34_p2, %p33_p0  ;;  %p2215_p6 = por %p40_p4, %p39_p3 }
   0xc   : > { %p105_p7 = scmp.eq.s32.totalorder %s2193_s16, 1  ;;  %p111_p8 = scmp.eq.s32.totalorder %s1829_s17, 1 }
   0xd   : > { %p1979_p10 = scmp.lt.s32.totalorder %s2130_s15, 2  ;;  %s137_s26 = sand.u32 1, %s2126_s14  }
   0xe   : > { %p2222_p11 = por %p105_p7, %p33_p0  ;;  %p2226_p12 = por %p111_p8, %p39_p3 }
   0xf   : > { %s1885_s27 = sshll.u32 %s2130_s15, 8  ;;  %s1832_s28 = sshll.u32 %s137_s26, 4 }
  0x10   : > { %s2490_s24 = scalar_select %p2222_p11, 1, 0 }
  0x11   : > { %s2491_s25 = scalar_select %p2226_p12, 1, 0 }
  0x12   : > { %s2235_s4 = scalar_lea.hbm %s2483_s0, %s1885_s27  ;;  %s141_s5 = scalar_lea.vmem [#allocation2], %s1832_s28 }
  0x13   : > { %s149_s6 = sshll.u32 %s141_s5, 4  ;;  %p2239_p13 = pnand %p1979_p10, %p2211_p5  ;;  %s2243_s6 = int_to_ptr.vmem [resolvable:$true] %s149_s6 }
  0x14   : > { %s138_s8 = scalar_lea.sflag [#allocation3], %s137_s26  ;;  %s2034_s9 = scalar_lea.hbm %s2235_s4, 256 }
  0x15   : > { %p2035_p2 = scmp.ne.s32.totalorder %s2235_s4, %s2034_s9  ;;  %p2036_p3 = pneg %p2239_p13 }
  0x16   : > { %s2039_s17 = scalar_lea.hbm %s2483_s0, 512  ;;  %p2040_p5 = scmp.lt.u32.totalorder %s2235_s4, %s2483_s0 }
  0x17   : > { %p2037_p4 = pnand %p2036_p3, %p2035_p2  ;;  %p2041_p8 = scmp.lt.u32.totalorder %s2039_s17, %s2034_s9 }
  0x18   : > { %p2043_p9 = scmp.lt.u32.totalorder %s2034_s9, %s2235_s4 }
  0x19   : > { %p2038_p7 = pneg %p2037_p4  ;;  %p2042_p10 = por %p2041_p8, %p2040_p5 }
  0x1b   : > { %p2044_p0 = por %p2043_p9, %p2042_p10 }
  0x1d   : > { %p2045_p1 = pnand %p2044_p0, %p2038_p7 }
  0x1f   : > { %2048 = shalt.err (!%p2045_p1)
}
  0x20   : > { %s2049_s22 = scalar_lea.vmem %s2243_s6, 256  ;;  %s2132_s26 = smov [#allocation2]  }
  0x21   : > { %p2050_p2 = scmp.ne.s32.totalorder %s2243_s6, %s2049_s22  ;;  %s2054_s27 = sshll.u32 %s2132_s26, 4  ;;  %s2055_s27 = int_to_ptr.vmem [resolvable:$false] %s2054_s27 }
  0x22   : > { %s2056_s28 = scalar_lea.vmem %s2055_s27, 512  ;;  %p2057_p11 = scmp.lt.s32.totalorder %s2243_s6, %s2055_s27 }
  0x23   : > { %p2052_p4 = pnand %p2050_p2, %p2036_p3  ;;  %p2058_p5 = scmp.lt.s32.totalorder %s2056_s28, %s2049_s22 }
  0x25   : > { %p2053_p12 = pneg %p2052_p4  ;;  %p2059_p8 = por %p2058_p5, %p2057_p11 }
  0x27   : > { %p2060_p9 = pnand %p2059_p8, %p2053_p12 }
  0x29   : > { %2063 = shalt.err (!%p2060_p9)
}
  0x2a   : > { %1974 = dma.hbm_to_vmem [thread:$0]  (!%p2239_p13), %s2235_s4, 256, %s2243_s6, %s138_s8  }
  0x2b   : > { %p2493_p0 = scmp.lt.s32.totalorder %s2130_s15, 3  ;;  %p2494_p1 = scmp.ge.s32.totalorder %s2130_s15, 1 }
  0x2d   : > { %p155_p3 = pnand %p2494_p1, %p2493_p0 }
  0x2e   : > { %s2277_s29 = sand.u32 (!%p155_p3), 1, %s2122_s13  }
  0x2f   : > { %158 = sbr.rel (%p155_p3) target bundleno = 479 (0x1df), region = 32  ;;  %s1836_s30 = sshll.u32 (!%p155_p3), %s2277_s29, 4 }
  0x30   : > { %s161_s5 = scalar_lea.sflag (!%p155_p3), [#allocation3], %s2277_s29  ;;  %s2281_s9 = scalar_lea.vmem (!%p155_p3), [#allocation2], %s1836_s30 }
  0x36   : > { %2109 = dma.done.wait (%p2215_p6), %s161_s5, 256  }
  0x37   : > { %2111 = vsyncadd (%p2215_p6), %s161_s5, 4294967040  ;;  %v2133_v0 = vmov 0.0   ;;  %v191_v1 = vld [vmem:[%s2281_s9 + $0x8] sm:$0xff]  ;;  %v2291_v2 = vld [vmem:[%s2281_s9] sm:$0xff]  ;;  %s2134_s4 = smov 127   ;;  %s2135_s7 = smov 124  }
  0x38   : > { %285 = vmatprep.mubr.f32.mxu0 %v2133_v0  ;;  %1904 = vmatprep.subr.mxu1 %v2133_v0  ;;  %v2296_v3 = vcombine.high %v2291_v2, %v2291_v2  ;;  %v2301_v4 = vld [vmem:[%s2484_s1] sm:$0xff]  ;;  %s2136_s8 = smov 126   ;;  %s2137_s10 = smov 120   ;;  %vm2138_vm0 = vmmov 0   ;;  %v198_v5 = vcombine.high %v191_v1, %v191_v1  ;;  %v2148_v6 = vmov 0  }
  0x39   : > { %203 = vrot.lane.b32.xlu0 %v191_v1, %s2134_s4  ;;  %199 = vrot.lane.b32.xlu1 %v2291_v2, %s2134_s4  ;;  %s2139_s11 = smov 110   ;;  %s2140_s17 = smov 116   ;;  %v1732_v7 = vld [vmem:[%s2485_s2] sm:$0xff]  ;;  %vm207_vm1 = vcmask 1039360   ;;  %vm214_vm2 = vcmask 1043456   ;;  %vm211_vm3 = vcmask 31744  }
  0x3a   : > { %1906 = vmatprep.mubr.msk.f32.mxu1 %vm2138_vm0, %v2133_v0  ;;  %s2141_s19 = smov 109   ;;  %s2142_s20 = smov 112   ;;  %2031 = vset.pattern.permute.xlu0 %v2148_v6  ;;  %vm532_vm4 = vcmask 1031168   ;;  %vm706_vm5 = vcmask 900096   ;;  %v188_v29 = vld [vmem:[%s2281_s9 + $0x8] sm:$0xf] }
  0x3b   : > { %s2143_s22 = smov 108   ;;  %s2144_s26 = smov 92   ;;  %vm880_vm6 = vcmask 891904   ;;  %vm1054_vm7 = vcmask 883712   ;;  %vm1228_vm8 = vcmask 752640   ;;  %vm1402_vm9 = vcmask 744448  }
  0x3c   : > { %s2145_s27 = smov 104   ;;  %s2146_s28 = smov 91   ;;  %vm1576_vm10 = vcmask 736256  }
  0x3d   : > { %201 = vrot.lane.b32.xlu0 %v2296_v3, %s2134_s4  ;;  %193 = vrot.lane.b32.xlu1 %v2301_v4, %s2135_s7  ;;  %s2147_s30 = smov 100   ;;  %s2149_s5 = smov 90  }
  0x3e   : > { %s1965_s9 = smul.u32 24, %s2277_s29  ;;  %p2495_p11 = scmp.ne.s32.totalorder %s2490_s24, 0 }
  0x3f   : > { %s1966_s7 = smul.u32 384, %s2193_s16  ;;  %s1745_s16 = scalar_lea.sflag [#allocation4], %s2277_s29 }
  0x41   : > { %526 = vrot.lane.b32.xlu0 %v2296_v3, %s2136_s8  ;;  %528 = vrot.lane.b32.xlu1 %v191_v1, %s2136_s8 }
  0x45   : > { %524 = vrot.lane.b32.xlu0 %v2291_v2, %s2136_s8  ;;  %518 = vrot.lane.b32.xlu1 %v2301_v4, %s2137_s10 }
  0x49   : > { %700 = vrot.lane.b32.xlu0 %v2296_v3, %s2139_s11  ;;  %702 = vrot.lane.b32.xlu1 %v191_v1, %s2139_s11 }
  0x4d   : > { %698 = vrot.lane.b32.xlu0 %v2291_v2, %s2139_s11  ;;  %692 = vrot.lane.b32.xlu1 %v2301_v4, %s2140_s17 }
  0x51   : > { %205 = vrot.lane.b32.xlu0 %v198_v5, %s2134_s4  ;;  %874 = vrot.lane.b32.xlu1 %v2296_v3, %s2141_s19  ;;  %s2150_s4 = smov 96  }
  0x55   : > { %876 = vrot.lane.b32.xlu0 %v191_v1, %s2141_s19  ;;  %872 = vrot.lane.b32.xlu1 %v2291_v2, %s2141_s19 }
  0x59   : > { %866 = vrot.lane.b32.xlu0 %v2301_v4, %s2142_s20  ;;  %530 = vrot.lane.b32.xlu1 %v198_v5, %s2136_s8  ;;  %s186_s8 = scalar_lea.vmem [#allocation5], %s1965_s9 }
  0x5a   : > { %s1759_s10 = sshll.u32 %s186_s8, 4  ;;  %s2441_s10 = int_to_ptr.vmem [resolvable:$true] %s1759_s10 }
  0x5b   : > { %s2064_s20 = scalar_lea.vmem %s2441_s10, 384 }
  0x5c   : > { %p2065_p6 = scmp.ne.s32.totalorder %s2441_s10, %s2064_s20 }
  0x5d   : > { %1048 = vrot.lane.b32.xlu0 %v2296_v3, %s2143_s22  ;;  %1050 = vrot.lane.b32.xlu1 %v191_v1, %s2143_s22 }
  0x5e   : > { %p2066_p12 = pnand %p2065_p6, %p2495_p11 }
  0x60   : > { %p2067_p13 = pneg %p2066_p12 }
  0x61   : > { %1046 = vrot.lane.b32.xlu0 %v2291_v2, %s2143_s22  ;;  %1040 = vrot.lane.b32.xlu1 %v2301_v4, %s2143_s22 }
  0x65   : > { %704 = vrot.lane.b32.xlu0 %v198_v5, %s2139_s11  ;;  %878 = vrot.lane.b32.xlu1 %v198_v5, %s2141_s19  ;;  %s2439_s19 = scalar_lea.hbm %s2486_s3, %s1966_s7 }
  0x69   : > { %1222 = vrot.lane.b32.xlu0 %v2296_v3, %s2144_s26  ;;  %1224 = vrot.lane.b32.xlu1 %v191_v1, %s2144_s26 }
  0x6d   : > { %1220 = vrot.lane.b32.xlu0 %v2291_v2, %s2144_s26  ;;  %1214 = vrot.lane.b32.xlu1 %v2301_v4, %s2145_s27 }
  0x71   : > { %1052 = vrot.lane.b32.xlu0 %v198_v5, %s2143_s22  ;;  %1226 = vrot.lane.b32.xlu1 %v198_v5, %s2144_s26  ;;  %s2151_s22 = smov [#allocation5]  }
  0x72   : > { %s2068_s26 = sshll.u32 %s2151_s22, 4  ;;  %s2069_s26 = int_to_ptr.vmem [resolvable:$false] %s2068_s26 }
  0x73   : > { %s2070_s27 = scalar_lea.vmem %s2069_s26, 768  ;;  %p2071_p7 = scmp.lt.s32.totalorder %s2441_s10, %s2069_s26 }
  0x74   : > { %p2072_p10 = scmp.lt.s32.totalorder %s2070_s27, %s2064_s20 }
  0x75   : > { %1396 = vrot.lane.b32.xlu0 %v2296_v3, %s2146_s28  ;;  %1398 = vrot.lane.b32.xlu1 %v191_v1, %s2146_s28 }
  0x76   : > { %p2073_p2 = por %p2072_p10, %p2071_p7 }
  0x78   : > { %p2074_p4 = pnand %p2073_p2, %p2067_p13 }
  0x79   : > { %1394 = vrot.lane.b32.xlu0 %v2291_v2, %s2146_s28  ;;  %1388 = vrot.lane.b32.xlu1 %v2301_v4, %s2147_s30 }
  0x7d   : > { %1400 = vrot.lane.b32.xlu0 %v198_v5, %s2146_s28  ;;  %1570 = vrot.lane.b32.xlu1 %v2296_v3, %s2149_s5 }
  0x81   : > { %1572 = vrot.lane.b32.xlu0 %v191_v1, %s2149_s5  ;;  %1574 = vrot.lane.b32.xlu1 %v198_v5, %s2149_s5 }
  0x85   : > { %1568 = vrot.lane.b32.xlu0 %v2291_v2, %s2149_s5  ;;  %1562 = vrot.lane.b32.xlu1 %v2301_v4, %s2150_s4 }
  0x89   : > { %1735 = vperm.xlu0 %2031, %v1732_v7  }
  0xab   : > { %v204_v8 = vpop.permute.xlu0 %203  ;;  %v200_v9 = vpop.permute.xlu1 %199 }
  0xaf   : > { %v202_v10 = vpop.permute.xlu0 %201  ;;  %v194_v11 = vpop.permute.xlu1 %193 }
  0xb0   : > { %v209_v12 = vsel %vm207_vm1, %v202_v10, %v204_v8  ;;  %v208_v13 = vsel %vm207_vm1, %v200_v9, %v202_v10 }
  0xb1   : > { %1837 = vmatprep.subr.msk.mxu0 %vm214_vm2, %v209_v12 }
  0xb2   : > { %1838 = vmatpush1.msk.msra.mxu0 %vm214_vm2, %v208_v13 }
  0xb3   : > { %v527_v14 = vpop.permute.xlu0 %526  ;;  %1839 = vmatmul.mubr.msk.f32.vlgmr.msra.gmra.mrb[0].mxu0 %vm211_vm3, %v194_v11  ;;  %v529_v15 = vpop.permute.xlu1 %528  ;;  %1842 = vmatprep.subr.msk.mxu0 %vm214_vm2, %v2296_v3 }
  0xb4   : > { %v534_v16 = vsel %vm532_vm4, %v527_v14, %v529_v15  ;;  %1843 = vmatpush1.msk.msra.mxu0 %vm214_vm2, %v2291_v2  ;;  %437 = vmatprep.mubr.f32.mxu0 %v2133_v0 }
  0xb5   : > { %1847 = vmatprep.subr.msk.mxu0 %vm214_vm2, %v534_v16 }
  0xb7   : > { %v525_v17 = vpop.permute.xlu0 %524  ;;  %v519_v18 = vpop.permute.xlu1 %518 }
  0xb8   : > { %v533_v19 = vsel %vm532_vm4, %v525_v17, %v527_v14 }
  0xbb   : > { %v701_v20 = vpop.permute.xlu0 %700  ;;  %v703_v21 = vpop.permute.xlu1 %702  ;;  %1844 = vmatmul.mubr.msk.f32.vlgmr.msra.gmra.mrb[0].mxu0 %vm211_vm3, %v2301_v4 }
  0xbc   : > { %v708_v22 = vsel %vm706_vm5, %v701_v20, %v703_v21  ;;  %1848 = vmatpush1.msk.msra.mxu0 %vm214_vm2, %v533_v19  ;;  %608 = vmatprep.mubr.f32.mxu0 %v2133_v0 }
  0xbd   : > { %1852 = vmatprep.subr.msk.mxu0 %vm214_vm2, %v708_v22 }
  0xbf   : > { %v699_v23 = vpop.permute.xlu0 %698  ;;  %v693_v24 = vpop.permute.xlu1 %692 }
  0xc0   : > { %v707_v25 = vsel %vm706_vm5, %v699_v23, %v701_v20 }
  0xc3   : > { %v206_v26 = vpop.permute.xlu0 %205  ;;  %v875_v27 = vpop.permute.xlu1 %874  ;;  %1849 = vmatmul.mubr.msk.f32.vlgmr.msra.gmra.mrb[0].mxu0 %vm211_vm3, %v519_v18 }
  0xc4   : > { %1853 = vmatpush1.msk.msra.mxu0 %vm214_vm2, %v707_v25  ;;  %v210_v28 = vsel %vm207_vm1, %v204_v8, %v206_v26  ;;  %782 = vmatprep.mubr.f32.mxu0 %v2133_v0 }
  0xc5   : > { %1905 = vmatpush3.msk.msra.mxu1 %vm214_vm2, %v210_v28 }
  0xc6   : > { %1907 = vmatmul.mubr.msk.f32.vlgmr.msra.gmra.mrb[0].mxu1 %vm211_vm3, %v194_v11  ;;  %1909 = vmatprep.subr.mxu1 %v2133_v0 }
  0xc7   : > { %v877_v30 = vpop.permute.xlu0 %876  ;;  %v873_v31 = vpop.permute.xlu1 %872  ;;  %1910 = vmatpush3.msk.msra.mxu1 %vm214_vm2, %v188_v29  ;;  %1911 = vmatprep.mubr.msk.f32.mxu1 %vm2138_vm0, %v2133_v0 }
  0xc8   : > { %v882_v32 = vsel %vm880_vm6, %v875_v27, %v877_v30  ;;  %1914 = vmatprep.subr.mxu1 %v2133_v0  ;;  %v881_v33 = vsel %vm880_vm6, %v873_v31, %v875_v27 }
  0xc9   : > { %1857 = vmatprep.subr.msk.mxu0 %vm214_vm2, %v882_v32 }
  0xca   : > { %1912 = vmatmul.mubr.msk.f32.vlgmr.msra.gmra.mrb[2].mxu1 %vm211_vm3, %v2301_v4 }
  0xcb   : > { %v867_v34 = vpop.permute.xlu0 %866  ;;  %v531_v35 = vpop.permute.xlu1 %530  ;;  %1854 = vmatmul.mubr.msk.f32.vlgmr.msra.gmra.mrb[0].mxu0 %vm211_vm3, %v693_v24  ;;  %1916 = vmatprep.mubr.msk.f32.mxu1 %vm2138_vm0, %v2133_v0 }
  0xcc   : > { %v535_v36 = vsel %vm532_vm4, %v529_v15, %v531_v35  ;;  %1858 = vmatpush1.msk.msra.mxu0 %vm214_vm2, %v881_v33  ;;  %956 = vmatprep.mubr.f32.mxu0 %v2133_v0 }
  0xcd   : > { %1915 = vmatpush3.msk.msra.mxu1 %vm214_vm2, %v535_v36 }
  0xce   : > { %1917 = vmatmul.mubr.msk.f32.vlgmr.msra.gmra.mrb[4].mxu1 %vm211_vm3, %v519_v18  ;;  %1919 = vmatprep.subr.mxu1 %v2133_v0 }
  0xcf   : > { %v1049_v37 = vpop.permute.xlu0 %1048  ;;  %v1051_v38 = vpop.permute.xlu1 %1050  ;;  %1921 = vmatprep.mubr.msk.f32.mxu1 %vm2138_vm0, %v2133_v0 }
  0xd0   : > { %v1056_v39 = vsel %vm1054_vm7, %v1049_v37, %v1051_v38 }
  0xd1   : > { %1862 = vmatprep.subr.msk.mxu0 %vm214_vm2, %v1056_v39 }
  0xd3   : > { %v1047_v40 = vpop.permute.xlu0 %1046  ;;  %v1041_v41 = vpop.permute.xlu1 %1040  ;;  %1859 = vmatmul.mubr.msk.f32.vlgmr.msra.gmra.mrb[0].mxu0 %vm211_vm3, %v867_v34 }
  0xd4   : > { %v1055_v42 = vsel %vm1054_vm7, %v1047_v40, %v1049_v37  ;;  %1130 = vmatprep.mubr.f32.mxu0 %v2133_v0 }
  0xd5   : > { %1863 = vmatpush1.msk.msra.mxu0 %vm214_vm2, %v1055_v42 }
  0xd7   : > { %v705_v43 = vpop.permute.xlu0 %704  ;;  %v879_v44 = vpop.permute.xlu1 %878 }
  0xd8   : > { %v709_v45 = vsel %vm706_vm5, %v703_v21, %v705_v43  ;;  %v883_v46 = vsel %vm880_vm6, %v877_v30, %v879_v44 }
  0xd9   : > { %1920 = vmatpush3.msk.msra.mxu1 %vm214_vm2, %v709_v45 }
  0xda   : > { %1922 = vmatmul.mubr.msk.f32.vlgmr.msra.gmra.mrb[6].mxu1 %vm211_vm3, %v693_v24  ;;  %1924 = vmatprep.subr.mxu1 %v2133_v0 }
  0xdb   : > { %v1223_v47 = vpop.permute.xlu0 %1222  ;;  %v1225_v48 = vpop.permute.xlu1 %1224  ;;  %1925 = vmatpush3.msk.msra.mxu1 %vm214_vm2, %v883_v46  ;;  %1864 = vmatmul.mubr.msk.f32.vlgmr.msra.gmra.mrb[0].mxu0 %vm211_vm3, %v1041_v41 }
  0xdc   : > { %v1230_v49 = vsel %vm1228_vm8, %v1223_v47, %v1225_v48  ;;  %1926 = vmatprep.mubr.msk.f32.mxu1 %vm2138_vm0, %v2133_v0  ;;  %1929 = vmatprep.subr.mxu1 %v2133_v0 }
  0xdd   : > { %1867 = vmatprep.subr.msk.mxu0 %vm214_vm2, %v1230_v49  ;;  %1304 = vmatprep.mubr.f32.mxu0 %v2133_v0 }
  0xde   : > { %1927 = vmatmul.mubr.msk.f32.vlgmr.msra.gmra.mrb[8].mxu1 %vm211_vm3, %v867_v34 }
  0xdf   : > { %v1221_v50 = vpop.permute.xlu0 %1220  ;;  %v1215_v51 = vpop.permute.xlu1 %1214  ;;  %1931 = vmatprep.mubr.msk.f32.mxu1 %vm2138_vm0, %v2133_v0 }
  0xe0   : > { %v1229_v52 = vsel %vm1228_vm8, %v1221_v50, %v1223_v47 }
  0xe1   : > { %1868 = vmatpush1.msk.msra.mxu0 %vm214_vm2, %v1229_v52 }
  0xe3   : > { %v1053_v53 = vpop.permute.xlu0 %1052  ;;  %v1227_v54 = vpop.permute.xlu1 %1226  ;;  %1869 = vmatmul.mubr.msk.f32.vlgmr.msra.gmra.mrb[0].mxu0 %vm211_vm3, %v1215_v51 }
  0xe4   : > { %v1057_v55 = vsel %vm1054_vm7, %v1051_v38, %v1053_v53  ;;  %1478 = vmatprep.mubr.f32.mxu0 %v2133_v0  ;;  %v1231_v56 = vsel %vm1228_vm8, %v1225_v48, %v1227_v54 }
  0xe5   : > { %1930 = vmatpush3.msk.msra.mxu1 %vm214_vm2, %v1057_v55 }
  0xe6   : > { %1932 = vmatmul.mubr.msk.f32.vlgmr.msra.gmra.mrb[10].mxu1 %vm211_vm3, %v1041_v41  ;;  %1934 = vmatprep.subr.mxu1 %v2133_v0 }
  0xe7   : > { %v1397_v57 = vpop.permute.xlu0 %1396  ;;  %v1399_v58 = vpop.permute.xlu1 %1398  ;;  %1935 = vmatpush3.msk.msra.mxu1 %vm214_vm2, %v1231_v56  ;;  %1936 = vmatprep.mubr.msk.f32.mxu1 %vm2138_vm0, %v2133_v0 }
  0xe8   : > { %v1404_v59 = vsel %vm1402_vm9, %v1397_v57, %v1399_v58  ;;  %1939 = vmatprep.subr.mxu1 %v2133_v0 }
  0xe9   : > { %1872 = vmatprep.subr.msk.mxu0 %vm214_vm2, %v1404_v59 }
  0xea   : > { %1937 = vmatmul.mubr.msk.f32.vlgmr.msra.gmra.mrb[12].mxu1 %vm211_vm3, %v1215_v51 }
  0xeb   : > { %v1395_v60 = vpop.permute.xlu0 %1394  ;;  %v1389_v61 = vpop.permute.xlu1 %1388  ;;  %1941 = vmatprep.mubr.msk.f32.mxu1 %vm2138_vm0, %v2133_v0 }
  0xec   : > { %v1403_v62 = vsel %vm1402_vm9, %v1395_v60, %v1397_v57 }
  0xed   : > { %1873 = vmatpush1.msk.msra.mxu0 %vm214_vm2, %v1403_v62 }
  0xee   : > { %1874 = vmatmul.mubr.msk.f32.vlgmr.msra.gmra.mrb[0].mxu0 %vm211_vm3, %v1389_v61 }
  0xef   : > { %v1401_v63 = vpop.permute.xlu0 %1400  ;;  %v1571_v1 = vpop.permute.xlu1 %1570  ;;  %1652 = vmatprep.mubr.f32.mxu0 %v2133_v0 }
  0xf0   : > { %v1405_v2 = vsel %vm1402_vm9, %v1399_v58, %v1401_v63 }
  0xf1   : > { %1940 = vmatpush3.msk.msra.mxu1 %vm214_vm2, %v1405_v2 }
  0xf2   : > { %1942 = vmatmul.mubr.msk.f32.vlgmr.msra.gmra.mrb[14].mxu1 %vm211_vm3, %v1389_v61  ;;  %1944 = vmatprep.subr.mxu1 %v2133_v0 }
  0xf3   : > { %v1573_v3 = vpop.permute.xlu0 %1572  ;;  %v1575_v4 = vpop.permute.xlu1 %1574  ;;  %1946 = vmatprep.mubr.msk.f32.mxu1 %vm2138_vm0, %v2133_v0 }
  0xf4   : > { %v1578_v5 = vsel %vm1576_vm10, %v1571_v1, %v1573_v3  ;;  %v1579_v6 = vsel %vm1576_vm10, %v1573_v3, %v1575_v4 }
  0xf5   : > { %1877 = vmatprep.subr.msk.mxu0 %vm214_vm2, %v1578_v5  ;;  %1945 = vmatpush3.msk.msra.mxu1 %vm214_vm2, %v1579_v6 }
  0xf7   : > { %v1569_v7 = vpop.permute.xlu0 %1568  ;;  %v1563_v8 = vpop.permute.xlu1 %1562 }
  0xf8   : > { %v1577_v9 = vsel %vm1576_vm10, %v1569_v7, %v1571_v1  ;;  %1947 = vmatmul.mubr.msk.f32.vlgmr.msra.gmra.mrb[16].mxu1 %vm211_vm3, %v1563_v8 }
  0xf9   : > { %1878 = vmatpush1.msk.msra.mxu0 %vm214_vm2, %v1577_v9 }
  0xfa   : > { %1879 = vmatmul.mubr.msk.f32.vlgmr.msra.gmra.mrb[0].mxu0 %vm211_vm3, %v1563_v8 }
 0x108   : > { %v1736_v33 = vpop.permute.xlu0 %1735 }
 0x199   : > { %v358_v10 = vpop.f32.mrb[0].mxu1 }
 0x19a   : > { %v1908_v11 = vpop.f32.mrb[1].mxu1 }
 0x19d   : > { %v510_v12 = vpop.f32.mrb[2].mxu1 }
 0x19e   : > { %v511_v13 = vadd.f32 %v510_v12, %v358_v10  ;;  %v1913_v0 = vpop.f32.mrb[3].mxu1 }
 0x1a1   : > { %v681_v14 = vpop.f32.mrb[4].mxu1 }
 0x1a2   : > { %v687_v15 = vadd.f32 %v681_v14, %v511_v13  ;;  %v1918_v16 = vpop.f32.mrb[5].mxu1 }
 0x1ad   : > { %v855_v17 = vpop.f32.mrb[6].mxu1 }
 0x1ae   : > { %v861_v18 = vadd.f32 %v855_v17, %v687_v15  ;;  %v1923_v19 = vpop.f32.mrb[7].mxu1 }
 0x1b1   : > { %v1029_v20 = vpop.f32.mrb[8].mxu1 }
 0x1b2   : > { %v1035_v21 = vadd.f32 %v1029_v20, %v861_v18  ;;  %v1928_v22 = vpop.f32.mrb[9].mxu1 }
 0x1b9   : > { %v1203_v23 = vpop.f32.mrb[10].mxu1 }
 0x1ba   : > { %v1209_v24 = vadd.f32 %v1203_v23, %v1035_v21  ;;  %v1933_v25 = vpop.f32.mrb[11].mxu1 }
 0x1bd   : > { %v1377_v26 = vpop.f32.mrb[12].mxu1 }
 0x1be   : > { %v1383_v27 = vadd.f32 %v1377_v26, %v1209_v24  ;;  %v1938_v28 = vpop.f32.mrb[13].mxu1 }
 0x1c5   : > { %v1551_v29 = vpop.f32.mrb[14].mxu1 }
 0x1c6   : > { %v1557_v30 = vadd.f32 %v1551_v29, %v1383_v27  ;;  %v1943_v31 = vpop.f32.mrb[15].mxu1 }
 0x1cb   : > { %v1725_v32 = vpop.f32.mrb[16].mxu1 }
 0x1cc   : > { %v1731_v34 = vadd.f32 %v1725_v32, %v1557_v30  ;;  %v1948_v35 = vpop.f32.mrb[17].mxu1 }
 0x1cd   : > { %v1654_v36 = vpop.f32.mrb[0].mxu0 }
 0x1ce   : > { %v1740_v37 = vadd.f32 %v1736_v33, %v1731_v34  ;;  %v1738_v38 = vadd.f32 %v1736_v33, %v1654_v36  ;;  %v1656_v39 = vpop.f32.mrb[1].mxu0 }
 0x1cf   : > { %v1739_v40 = vadd.f32 %v1736_v33, %v1656_v39 }
 0x1d0   : > { %1743 = vst [vmem:[%s186_s8 + $0x10] sm:$0xff] %v1740_v37  ;;  %1741 = vst [vmem:[%s186_s8] sm:$0xff] %v1738_v38 }
 0x1d1   : > { %1742 = vst [vmem:[%s186_s8 + $0x8] sm:$0xff] %v1739_v40 }
 0x1d2   : > { %2077 = shalt.err (!%p2074_p4)
}
 0x1d3   : > { %s2078_s29 = scalar_lea.hbm %s2439_s19, 384  ;;  %s2082_s5 = scalar_lea.hbm %s2486_s3, 768 }
 0x1d4   : > { %p2079_p5 = scmp.ne.s32.totalorder %s2439_s19, %s2078_s29  ;;  %p2083_p0 = scmp.lt.u32.totalorder %s2439_s19, %s2486_s3 }
 0x1d5   : > { %p2084_p1 = scmp.lt.u32.totalorder %s2082_s5, %s2078_s29  ;;  %p2086_p6 = scmp.lt.u32.totalorder %s2078_s29, %s2439_s19 }
 0x1d6   : > { %p2080_p8 = pnand %p2079_p5, %p2495_p11 }
 0x1d7   : > { %p2085_p3 = por %p2084_p1, %p2083_p0 }
 0x1d8   : > { %p2081_p9 = pneg %p2080_p8 }
 0x1d9   : > { %p2087_p12 = por %p2086_p6, %p2085_p3 }
 0x1db   : > { %p2088_p13 = pnand %p2087_p12, %p2081_p9 }
 0x1dd   : > { %2091 = shalt.err (!%p2088_p13)
}
 0x1de   : > { %1969 = dma.vmem_to_hbm [thread:$0]  (%p2495_p11), %s2441_s10, 384, %s2439_s19, %s1745_s16  }
 0x1df PF: > { %s1771_s6 = sand.u32 1, %s2118_s12   ;;  %p2496_p7 = scmp.ne.s32.totalorder %s2491_s25, 0 }
 0x1e0   : > { %p2497_p10 = scmp.ge.s32.totalorder %s2130_s15, 2  ;;  %s1772_s9 = scalar_lea.sflag [#allocation4], %s1771_s6 }
 0x1e2   : > { %p1976_p2 = pnand %p2497_p10, %p2496_p7 }
 0x1e4   : > { %2113 = dma.done.wait (!%p1976_p2), %s1772_s9, 384  }
 0x1e5   : > { %2115 = vsyncadd (!%p1976_p2), %s1772_s9, 4294966912  ;;  %p16_p4 = scmp.ge.s32.totalorder %s2197_s18, 4   ;;  %s2498_s12 = smov %s2122_s13 }
 0x1e6   : > { %s2499_s13 = smov %s2126_s14  ;;  %s2500_s14 = smov %s2209_s21 }
 0x1e7   : > { %s2501_s15 = smov %s2197_s18  ;;  %18 = sbr.rel (!%p16_p4) target bundleno = 5 (0x5), region = 77 }
 0x1ee   :  { %1777 = vsyncpa [#allocation3], 1 }
 0x1ef   :  { %1779 = vsyncpa [#allocation3 + $0x1], 1 }
 0x1f0   :  { %1780 = vsyncpa [#allocation4], 1 }
 0x1f1   :  { %1782 = vsyncpa [#allocation4 + $0x1], 1 }

</bundles_post_ra>
